<compile_context>
chip_gen: v6e
topology: v6e:2x2x1
jax: 0.10.0
libtpu: 0.0.40
codegen_flags: <defaults>
</compile_context>

<pallas_src>
import functools

import jax
import jax.numpy as jnp
from jax.experimental import pallas as pl
from jax.experimental.pallas import tpu as pltpu


def _focal_nll_kernel(logits_ref, labels_ref, out_ref, *, gamma, hw, t_hw):
    """One grid step = one (1, C, t_hw) tile of logits (spatial on lanes)."""
    j = pl.program_id(1)

    x = logits_ref[...].astype(jnp.float32)          # (1, C, t_hw)
    lab = labels_ref[...]                            # (1, 1, t_hw) int32

    # log-sum-exp along the class (sublane) axis.
    m = jnp.max(x, axis=1, keepdims=True)            # (1, 1, t_hw)
    z = x - m
    e = jnp.exp(z)
    s = jnp.sum(e, axis=1, keepdims=True)            # (1, 1, t_hw)
    log_s = jnp.log(s)

    # Gather the label-class entry of each column (one-hot sublane reduce).
    class_ids = jax.lax.broadcasted_iota(jnp.int32, x.shape, dimension=1)
    onehot = class_ids == lab                        # (1, C, t_hw)
    picked_z = jnp.sum(jnp.where(onehot, z, 0.0), axis=1, keepdims=True)

    picked_ls = picked_z - log_s                     # log_softmax at the label
    picked_sm = jnp.exp(picked_ls)                   # softmax at the label
    d = 1.0 - picked_sm

    # Focal factor only on the picked element; avoid jnp.power's exp+log when
    # gamma is a small integer (gamma=2 -> one extra VPU multiply).
    if float(gamma) == float(int(gamma)) and 0 <= int(gamma) <= 4:
        factor = jnp.ones_like(d)
        for _ in range(int(gamma)):
            factor = factor * d
    else:
        factor = jnp.power(d, jnp.float32(gamma))

    loss_cols = factor * picked_ls                   # (1, 1, t_hw)

    # Mask the ragged last spatial tile (columns >= H*W are padding).
    col = j * t_hw + jax.lax.broadcasted_iota(jnp.int32, loss_cols.shape, 2)
    loss_cols = jnp.where(col < hw, loss_cols, 0.0)

    # Per-block partial sum, written lane-dense; the wrapper reads [..., 0, 0].
    partial = jnp.sum(loss_cols)
    out_ref[...] = jnp.broadcast_to(partial, out_ref.shape).astype(jnp.float32)


def _choose_spatial_tile(hw, c, *, target_block_bytes=4 * 1024 * 1024,
                         max_cols=16 * 1024):
    """Pick a big, 128-multiple lane tile (or the full dim if H*W <= 128)."""
    if hw <= 128:
        return hw
    cols_by_budget = max(128, (target_block_bytes // (c * 4)) // 128 * 128)
    return min(cols_by_budget, max_cols, (hw // 128) * 128)


def softmax_focal_loss(logits, labels, *, gamma=2.0, ohem_percent=0.5,
                       target_block_bytes=4 * 1024 * 1024):
    """Matches SoftmaxFocalLoss.forward(logits, labels) from loss.py."""
    if logits.ndim == 4:
        n, c, h, w = logits.shape
        hw = h * w
        logits3 = logits.reshape(n, c, hw)                 # free view, stays NCHW
        labels3 = labels.reshape(n, 1, hw).astype(jnp.int32)
    elif logits.ndim == 2:
        n, c = logits.shape
        hw = 1
        logits3 = logits.reshape(n, c, 1)
        labels3 = labels.reshape(n, 1, 1).astype(jnp.int32)
    else:
        raise ValueError("logits must be (N, C) or (N, C, H, W)")

    t_hw = _choose_spatial_tile(hw, c, target_block_bytes=target_block_bytes)
    grid_hw = (hw + t_hw - 1) // t_hw
    grid = (n, grid_hw)

    # VMEM budget: double-buffered logits/labels blocks + output block + slack.
    block_bytes = (c * t_hw + t_hw + 8 * 128) * 4
    vmem_limit = int(min(48 * 2 ** 20, max(16 * 2 ** 20, 4 * block_bytes)))

    kernel = functools.partial(_focal_nll_kernel, gamma=float(gamma), hw=hw,
                               t_hw=t_hw)
    partials = pl.pallas_call(
        kernel,
        out_shape=jax.ShapeDtypeStruct((n, grid_hw, 8, 128), jnp.float32),
        grid_spec=pltpu.PrefetchScalarGridSpec(
            num_scalar_prefetch=0,
            grid=grid,
            in_specs=[
                pl.BlockSpec((1, c, t_hw), lambda i, j: (i, 0, j)),   # logits
                pl.BlockSpec((1, 1, t_hw), lambda i, j: (i, 0, j)),   # labels
            ],
            out_specs=pl.BlockSpec((1, 1, 8, 128), lambda i, j: (i, j, 0, 0)),
        ),
        compiler_params=pltpu.CompilerParams(
            dimension_semantics=("parallel", "parallel"),
            vmem_limit_bytes=vmem_limit,
        ),
    )(logits3, labels3)

    total = jnp.sum(partials[:, :, 0, 0])
    mean_loss = -(total / jnp.float32(n * hw))   # nn.NLLLoss default 'mean'

    # torch: nn.NLLLoss() returns a 0-d tensor; .topk(k) on it is only valid
    # for k in {0, 1}, with k = int(OHEM_percent * logits.shape[0]) (batch N).
    k = int(ohem_percent * logits.shape[0])
    if k <= 0:
        return jnp.zeros((0,), jnp.float32)
    # TODO(synk): torch raises for k > 1 (topk on a 0-d tensor); k == 1 returns
    # the scalar itself, which is what we return here.
    return mean_loss


if __name__ == "__main__":
    key = jax.random.PRNGKey(0)

    def _reference(logits, labels, gamma):
        c = logits.shape[1]
        x = jnp.transpose(logits, (0, 2, 3, 1)).reshape(-1, c)
        ls = jax.nn.log_softmax(x, axis=-1)
        sm = jax.nn.softmax(x, axis=-1)
        wgt = jnp.power(1.0 - sm, gamma) * ls
        picked = jnp.take_along_axis(wgt, labels.reshape(-1, 1), axis=-1)[:, 0]
        return -jnp.mean(picked)

    gamma = 2.0
    ohem_percent = 0.5   # int(0.5 * N) == 1 -> torch's topk-on-scalar returns the loss

    # Main case (module's typical NCHW segmentation-style input).
    k1, k2 = jax.random.split(key)
    n, c, h, w = 2, 4, 16, 16
    logits = jax.random.normal(k1, (n, c, h, w), dtype=jnp.float32)
    labels = jax.random.randint(k2, (n, h, w), 0, c, dtype=jnp.int32)
    loss = softmax_focal_loss(logits, labels, gamma=gamma,
                              ohem_percent=ohem_percent)
    loss = jax.block_until_ready(loss)
    ref = _reference(logits, labels, gamma)
    assert jnp.allclose(loss, ref, atol=1e-5, rtol=1e-5), (loss, ref)

    # Ragged spatial extent (H*W not a multiple of the 128-lane tile).
    k3, k4 = jax.random.split(k1)
    n2, c2, h2, w2 = 2, 4, 15, 20
    logits2 = jax.random.normal(k3, (n2, c2, h2, w2), dtype=jnp.float32)
    labels2 = jax.random.randint(k4, (n2, h2, w2), 0, c2, dtype=jnp.int32)
    loss2 = softmax_focal_loss(logits2, labels2, gamma=gamma,
                               ohem_percent=ohem_percent)
    loss2 = jax.block_until_ready(loss2)
    ref2 = _reference(logits2, labels2, gamma)
    assert jnp.allclose(loss2, ref2, atol=1e-5, rtol=1e-5), (loss2, ref2)

    print("KERNEL_OK")
</pallas_src>

<mosaic_0001>
module attributes {stable_mosaic.version = 11 : i64} {
  func.func @_focal_nll_kernel(%arg0: i32, %arg1: i32, %arg2: memref<1x4x256xf32, #tpu.memory_space<vmem>>, %arg3: memref<1x1x256xi32, #tpu.memory_space<vmem>>, %arg4: memref<1x1x8x128xf32, #tpu.memory_space<vmem>>) attributes {dimension_semantics = [#tpu.dimension_semantics<parallel>, #tpu.dimension_semantics<parallel>], iteration_bounds = array<i64: 2, 1>, scalar_prefetch = 0 : i64, scratch_operands = 0 : i64, tpu.core_type = #tpu.core_type<tc>, window_params = [{transform_indices = @transform_0, window_bounds = array<i64: 1, 4, 256>}, {transform_indices = @transform_1, window_bounds = array<i64: 1, 1, 256>}, {transform_indices = @transform_2, window_bounds = array<i64: 1, 1, 8, 128>}]} {
    %c0 = arith.constant 0 : index
    %c0_0 = arith.constant 0 : index
    %c0_1 = arith.constant 0 : index
    %0 = vector.load %arg2[%c0, %c0_0, %c0_1] : memref<1x4x256xf32, #tpu.memory_space<vmem>>, vector<1x4x256xf32>
    %c0_2 = arith.constant 0 : index
    %c0_3 = arith.constant 0 : index
    %c0_4 = arith.constant 0 : index
    %1 = vector.load %arg3[%c0_2, %c0_3, %c0_4] : memref<1x1x256xi32, #tpu.memory_space<vmem>>, vector<1x1x256xi32>
    %cst = arith.constant dense<0xFF800000> : vector<1x256xf32>
    %2 = vector.multi_reduction <maximumf>, %0, %cst [1] : vector<1x4x256xf32> to vector<1x256xf32>
    %3 = vector.shape_cast %2 : vector<1x256xf32> to vector<1x1x256xf32>
    %4 = vector.broadcast %3 : vector<1x1x256xf32> to vector<1x4x256xf32>
    %5 = arith.subf %0, %4 : vector<1x4x256xf32>
    %6 = math.exp %5 : vector<1x4x256xf32>
    %cst_5 = arith.constant dense<0.000000e+00> : vector<1x256xf32>
    %7 = vector.multi_reduction <add>, %6, %cst_5 [1] : vector<1x4x256xf32> to vector<1x256xf32>
    %8 = vector.shape_cast %7 : vector<1x256xf32> to vector<1x1x256xf32>
    %9 = math.log %8 : vector<1x1x256xf32>
    %10 = tpu.iota {dimensions = array<i32: 1>} : vector<1x4x256xi32>
    %11 = vector.broadcast %1 : vector<1x1x256xi32> to vector<1x4x256xi32>
    %12 = arith.cmpi eq, %10, %11 : vector<1x4x256xi32>
    %cst_6 = arith.constant 0.000000e+00 : f32
    %13 = vector.broadcast %cst_6 : f32 to vector<1x4x256xf32>
    %14 = arith.select %12, %5, %13 : vector<1x4x256xi1>, vector<1x4x256xf32>
    %cst_7 = arith.constant dense<0.000000e+00> : vector<1x256xf32>
    %15 = vector.multi_reduction <add>, %14, %cst_7 [1] : vector<1x4x256xf32> to vector<1x256xf32>
    %16 = vector.shape_cast %15 : vector<1x256xf32> to vector<1x1x256xf32>
    %17 = arith.subf %16, %9 : vector<1x1x256xf32>
    %18 = math.exp %17 : vector<1x1x256xf32>
    %cst_8 = arith.constant 1.000000e+00 : f32
    %19 = vector.broadcast %cst_8 : f32 to vector<1x1x256xf32>
    %20 = arith.subf %19, %18 : vector<1x1x256xf32>
    %cst_9 = arith.constant 1.000000e+00 : f32
    %21 = vector.broadcast %cst_9 : f32 to vector<1x1x256xf32>
    %22 = arith.mulf %21, %20 : vector<1x1x256xf32>
    %23 = arith.mulf %22, %20 : vector<1x1x256xf32>
    %24 = arith.mulf %23, %17 : vector<1x1x256xf32>
    %c256_i32 = arith.constant 256 : i32
    %25 = arith.muli %arg1, %c256_i32 : i32
    %26 = tpu.iota {dimensions = array<i32: 2>} : vector<1x1x256xi32>
    %27 = vector.broadcast %25 : i32 to vector<1x1x256xi32>
    %28 = arith.addi %27, %26 : vector<1x1x256xi32>
    %c256_i32_10 = arith.constant 256 : i32
    %29 = vector.broadcast %c256_i32_10 : i32 to vector<1x1x256xi32>
    %30 = arith.cmpi slt, %28, %29 : vector<1x1x256xi32>
    %cst_11 = arith.constant 0.000000e+00 : f32
    %31 = vector.broadcast %cst_11 : f32 to vector<1x1x256xf32>
    %32 = arith.select %30, %24, %31 : vector<1x1x256xi1>, vector<1x1x256xf32>
    %33 = vector.shape_cast %32 : vector<1x1x256xf32> to vector<1x1x1x256xf32>
    %cst_12 = arith.constant dense<0.000000e+00> : vector<1xf32>
    %34 = vector.multi_reduction <add>, %33, %cst_12 [1, 2, 3] : vector<1x1x1x256xf32> to vector<1xf32>
    %35 = vector.shape_cast %34 : vector<1xf32> to vector<1x1x1x1xf32>
    %36 = vector.extract %35[0, 0, 0, 0] : f32 from vector<1x1x1x1xf32>
    %37 = vector.broadcast %36 : f32 to vector<1x1x8x128xf32>
    %c0_13 = arith.constant 0 : index
    %c0_14 = arith.constant 0 : index
    %c0_15 = arith.constant 0 : index
    %c0_16 = arith.constant 0 : index
    %38 = vector.load %arg4[%c0_13, %c0_14, %c0_15, %c0_16] : memref<1x1x8x128xf32, #tpu.memory_space<vmem>>, vector<1x1x8x128xf32>
    tpu.vector_store %arg4[%c0_13, %c0_14, %c0_15, %c0_16], %37 {strides = array<i32>} : memref<1x1x8x128xf32, #tpu.memory_space<vmem>>, vector<1x1x8x128xf32>,
    return
  }
  func.func @transform_0(%arg0: i32, %arg1: i32) -> (i32, i32, i32) {
    %c0_i32 = arith.constant 0 : i32
    %c0_i32_0 = arith.constant 0 : i32
    return %arg0, %c0_i32, %arg1 : i32, i32, i32
  }
  func.func @transform_1(%arg0: i32, %arg1: i32) -> (i32, i32, i32) {
    %c0_i32 = arith.constant 0 : i32
    %c0_i32_0 = arith.constant 0 : i32
    return %arg0, %c0_i32, %arg1 : i32, i32, i32
  }
  func.func @transform_2(%arg0: i32, %arg1: i32) -> (i32, i32, i32, i32) {
    %c0_i32 = arith.constant 0 : i32
    %c0_i32_0 = arith.constant 0 : i32
    %c0_i32_1 = arith.constant 0 : i32
    return %arg0, %arg1, %c0_i32, %c0_i32_0 : i32, i32, i32, i32
  }
}

</mosaic_0001>

<bundles_post_ra>
// kernel: tpu_custom_call.1
= control target key start
LH: loop header
LB: loop body
LE: loop exit
PB: predicated region body
PF: predicated region fallthrough
CT: control target
= control target key end

     0   :  { %7 = vsyncpa [#allocation3], 0  ;;  %s902_s0 = inlined_call_operand.hbm [shape: f32[2,4,256], index: 0, kind: input, shape index: {}]   ;;  %s903_s1 = inlined_call_operand.hbm [shape: s32[2,1,256], index: 1, kind: input, shape index: {}]   ;;  %s904_s2 = inlined_call_operand.hbm [shape: f32[2,1,8,128], index: 2, kind: output, shape index: {}]  }
   0x1   :  { %9 = vsyncpa [#allocation3 + $0x1], 0 }
   0x2   :  { %10 = vsyncpa [#allocation6], 0 }
   0x3   :  { %12 = vsyncpa [#allocation6 + $0x1], 0 }
   0x4   :  { %13 = vsyncpa [#allocation4], 0 }
   0x5   :  { %15 = vsyncpa [#allocation4 + $0x1], 0  ;;  %s722_s9 = smov 0   ;;  %s724_s10 = smov 0  }
   0x6   :  { %s726_s11 = smov 0   ;;  %s728_s12 = smov 0  }
   0x7   :  { %s730_s13 = smov 0   ;;  %s732_s14 = smov 0  }
   0x8 LB: > { %s462_s15 = sadd.s32 4294967295, %s702_s14   ;;  %s463_s16 = sadd.s32 4294967294, %s702_s14   ;;  %s702_s14 = sphi %s732_s14, %s21_s14   ;;  %s698_s13 = sphi %s730_s13, %s916_s13   ;;  %s694_s12 = sphi %s728_s12, %s915_s12   ;;  %s690_s11 = sphi %s726_s11, %s914_s11   ;;  %s686_s10 = sphi %s724_s10, %s913_s10   ;;  %s682_s9 = sphi %s722_s9, %s912_s9  }
   0x9   : > { %s33_s17 = sadd.s32 1, %s698_s13  ;;  %s42_s18 = sadd.s32 1, %s690_s11 }
   0xa   : > { %p35_p0 = scmp.ge.s32.totalorder %s33_s17, 2  ;;  %p49_p1 = scmp.ne.s32.totalorder %s690_s11, %s686_s10 }
   0xb   : > { %p50_p2 = scmp.eq.s32.totalorder %s702_s14, 0  ;;  %p55_p3 = scmp.ne.s32.totalorder %s686_s10, %s682_s9 }
   0xc   : > { %s918_s17 = smov (%p35_p0, %s33_s17), 0  ;;  %p56_p5 = scmp.eq.s32.totalorder %s462_s15, 0 }
   0xd   : > { %p763_p4 = por %p50_p2, %p49_p1  ;;  %s37_s20 = ssub.s32 %s698_s13, %s918_s17 }
   0xe   : > { %p109_p6 = scmp.eq.s32.totalorder %s462_s15, 1  ;;  %p40_p7 = scmp.eq.s32.totalorder %s37_s20, 0 }
   0xf   : > { %p769_p8 = por %p56_p5, %p55_p3  ;;  %p115_p10 = scmp.eq.s32.totalorder %s463_s16, 1 }
  0x10   : > { %p773_p9 = por %p109_p6, %p49_p1  ;;  %p501_p13 = scmp.lt.s32.totalorder %s702_s14, 2 }
  0x11   : > { %s778_s23 = scalar_select %p40_p7, %s690_s11, %s42_s18  }
  0x12   : > { %p780_p11 = por %p115_p10, %p55_p3  ;;  %s787_s25 = sand.u32 1, %s690_s11  }
  0x13   : > { %s466_s26 = sshll.u32 %s787_s25, 3  ;;  %s480_s27 = sshll.u32 %s698_s13, 7 }
  0x14   : > { %s147_s30 = scalar_lea.hbm %s902_s0, %s480_s27  ;;  %s139_s3 = scalar_lea.vmem [#allocation2], %s466_s26 }
  0x15   : > { %s149_s4 = sshll.u32 %s139_s3, 4  ;;  %p796_p0 = pnand %p501_p13, %p763_p4  ;;  %s150_s4 = int_to_ptr.vmem [resolvable:$true] %s149_s4 }
  0x16   : > { %p472_p1 = scmp.ge.s32.totalorder %s702_s14, 1  ;;  %p175_p2 = scmp.lt.s32.totalorder %s702_s14, 3 }
  0x17   : > { %s136_s6 = scalar_lea.sflag [#allocation3], %s787_s25  ;;  %p564_p3 = pneg %p796_p0 }
  0x18   : > { %s575_s7 = scalar_lea.vmem %s150_s4, 128  ;;  %s704_s8 = smov [#allocation2]  }
  0x19   : > { %p576_p5 = scmp.ne.s32.totalorder %s150_s4, %s575_s7  ;;  %s580_s15 = sshll.u32 %s704_s8, 4  ;;  %s581_s15 = int_to_ptr.vmem [resolvable:$false] %s580_s15 }
  0x1a   : > { %s582_s16 = scalar_lea.vmem %s581_s15, 256  ;;  %p583_p4 = scmp.lt.s32.totalorder %s150_s4, %s581_s15 }
  0x1b   : > { %p578_p6 = pnand %p576_p5, %p564_p3  ;;  %p584_p10 = scmp.lt.s32.totalorder %s582_s16, %s575_s7 }
  0x1d   : > { %p579_p7 = pneg %p578_p6  ;;  %p585_p13 = por %p584_p10, %p583_p4 }
  0x1f   : > { %p586_p12 = pnand %p585_p13, %p579_p7 }
  0x21   : > { %589 = shalt.err (!%p586_p12)
}
  0x22   : > { %493 = dma.hbm_to_vmem [thread:$0]  (!%p796_p0), %s147_s30, 128, %s150_s4, %s136_s6  }
  0x23   : > { %p814_p5 = pnand %p472_p1, %p175_p2  ;;  %s469_s19 = sshll.u32 %s787_s25, 1 }
  0x24   : > { %s481_s20 = sshll.u32 %s698_s13, 5  ;;  %s160_s29 = scalar_lea.vmem [#allocation5], %s469_s19 }
  0x25   : > { %s168_s28 = scalar_lea.hbm %s903_s1, %s481_s20  ;;  %s170_s3 = sshll.u32 %s160_s29, 4  ;;  %s171_s3 = int_to_ptr.vmem [resolvable:$true] %s170_s3 }
  0x26   : > { %s157_s7 = scalar_lea.sflag [#allocation6], %s787_s25  ;;  %s603_s8 = scalar_lea.vmem %s171_s3, 32 }
  0x27   : > { %p604_p12 = scmp.ne.s32.totalorder %s171_s3, %s603_s8  ;;  %s705_s30 = smov [#allocation5]  }
  0x28   : > { %s608_s4 = sshll.u32 %s705_s30, 4  ;;  %s609_s4 = int_to_ptr.vmem [resolvable:$false] %s608_s4 }
  0x29   : > { %p606_p6 = pnand %p604_p12, %p564_p3  ;;  %s610_s6 = scalar_lea.vmem %s609_s4, 64 }
  0x2a   : > { %p611_p1 = scmp.lt.s32.totalorder %s171_s3, %s609_s4  ;;  %p612_p2 = scmp.lt.s32.totalorder %s610_s6, %s603_s8 }
  0x2b   : > { %p607_p7 = pneg %p606_p6 }
  0x2c   : > { %p613_p4 = por %p612_p2, %p611_p1 }
  0x2e   : > { %p614_p10 = pnand %p613_p4, %p607_p7 }
  0x30   : > { %617 = shalt.err (!%p614_p10)
}
  0x31   : > { %496 = dma.hbm_to_vmem [thread:$0]  (!%p796_p0), %s168_s28, 32, %s171_s3, %s157_s7  }
  0x32   : > { %179 = sbr.rel (%p814_p5) target bundleno = 367 (0x16f), region = 28  ;;  %s832_s25 = sand.u32 (!%p814_p5), 1, %s686_s10  }
  0x33   : > { %s473_s15 = sshll.u32 (!%p814_p5), %s832_s25, 3  ;;  %s182_s16 = scalar_lea.sflag (!%p814_p5), [#allocation3], %s832_s25 }
  0x34   : > { %s185_s19 = scalar_lea.vmem (!%p814_p5), [#allocation2], %s473_s15 }
  0x37   : > { %669 = dma.done.wait (%p769_p8), %s182_s16, 128  }
  0x38   : > { %671 = vsyncadd (%p769_p8), %s182_s16, 4294967168  ;;  %s474_s5 = sshll.u32 %s832_s25, 1  ;;  %s191_s18 = scalar_lea.sflag [#allocation6], %s832_s25 }
  0x39   : > { %s194_s20 = scalar_lea.vmem [#allocation5], %s474_s5 }
  0x3a   : > { %673 = dma.done.wait (%p769_p8), %s191_s18, 32  }
  0x3b   : > { %675 = vsyncadd (%p769_p8), %s191_s18, 4294967264  ;;  %vm227_vm0 = vcmask 1043456   ;;  %v222_v0 = vld [vmem:[%s185_s19] sm:$0xff]  ;;  %v270_v17 = vlaneseq  ;;  %v223_v22 = vld [vmem:[%s194_s20] sm:$0x3]  ;;  %vm324_vm3 = vcmask 1040384  }
  0x3c   : > { %v225_v1 = vcombine.high %v222_v0, %v222_v0  ;;  %v228_v2 = vsel %vm227_vm0, %v222_v0, -inf  ;;  %s219_s21 = scalar_lea.vmem [#allocation7], %s473_s15  ;;  %s477_s27 = sshll.u32 %s694_s12, 7 }
  0x3d   : > { %v229_v3 = vrot.slane %v228_v2, 4  ;;  %v271_v20 = vshrl.u32 %v270_v17, 7  ;;  %s354_s26 = sshll.u32 %s219_s21, 4  ;;  %s352_s7 = scalar_lea.hbm %s904_s2, %s477_s27  ;;  %s857_s26 = int_to_ptr.vmem [resolvable:$true] %s354_s26 }
  0x3e   : > { %v235_v4 = vsel %vm227_vm0, %v225_v1, -inf  ;;  %s340_s8 = scalar_lea.sflag [#allocation4], %s832_s25  ;;  %s618_s30 = scalar_lea.vmem %s857_s26, 128 }
  0x3f   : > { %v230_v5 = vmax.f32 %v228_v2, %v229_v3  ;;  %v236_v6 = vrot.slane %v235_v4, 4  ;;  %v274_v21 = vsub.s32 0, %v271_v20  ;;  %v278_v23 = vsub.s32 1, %v271_v20  ;;  %p619_p8 = scmp.ne.s32.totalorder %s857_s26, %s618_s30  ;;  %s706_s4 = smov [#allocation7]  }
  0x40   : > { %s622_s12 = sshll.u32 %s706_s4, 4  ;;  %s623_s12 = int_to_ptr.vmem [resolvable:$false] %s622_s12 }
  0x41   : > { %v231_v7 = vrot.slane %v230_v5, 2  ;;  %v237_v8 = vmax.f32 %v235_v4, %v236_v6  ;;  %v275_v24 = vrot.slane %v223_v22, %v274_v21  ;;  %v279_v25 = vrot.slane %v223_v22, %v278_v23  ;;  %p620_p0 = pnand %p619_p8, %p773_p9  ;;  %s624_s6 = scalar_lea.vmem %s623_s12, 256 }
  0x42   : > { %p625_p13 = scmp.lt.s32.totalorder %s857_s26, %s623_s12  ;;  %p626_p5 = scmp.lt.s32.totalorder %s624_s6, %s618_s30 }
  0x43   : > { %v232_v9 = vmax.f32 %v230_v5, %v231_v7  ;;  %v238_v10 = vrot.slane %v237_v8, 2  ;;  %vm280_vm1 = vcmp.eq.s32.totalorder %v271_v20, %v275_v24  ;;  %vm281_vm2 = vcmp.eq.s32.totalorder %v271_v20, %v279_v25  ;;  %p621_p3 = pneg %p620_p0 }
  0x44   : > { %p627_p12 = por %p626_p5, %p625_p13 }
  0x45   : > { %v233_v11 = vrot.slane %v232_v9, 1  ;;  %v239_v12 = vmax.f32 %v237_v8, %v238_v10 }
  0x46   : > { %p628_p6 = pnand %p627_p12, %p621_p3 }
  0x47   : > { %v234_v13 = vmax.f32 %v232_v9, %v233_v11  ;;  %v240_v14 = vrot.slane %v239_v12, 1 }
  0x49   : > { %v241_v15 = vmax.f32 %v239_v12, %v240_v14 }
  0x4b   : > { %v244_v16 = vcombine.low %v234_v13, %v241_v15 }
  0x4d   : > { %v246_v18 = vsub.f32 %v222_v0, %v244_v16 }
  0x4f   : > { %v247_v19 = vmul.f32 1.442695, %v246_v18  ;;  %v283_v26 = vcombine.high %v246_v18, %v246_v18  ;;  %v285_v28 = vsel %vm280_vm1, %v246_v18, 0.0 }
  0x50   : > { %v287_v34 = vsel %vm227_vm0, %v285_v28, 0.0 }
  0x51   : > { %552 = vpow2.f32 %v247_v19  ;;  %v286_v32 = vsel %vm281_vm2, %v283_v26, 0.0  ;;  %v288_v40 = vrot.slane %v287_v34, 4 }
  0x52   : > { %v294_v37 = vsel %vm227_vm0, %v286_v32, 0.0 }
  0x53   : > { %v295_v43 = vrot.slane %v294_v37, 4  ;;  %v289_v46 = vadd.f32 %v288_v40, %v287_v34 }
  0x55   : > { %v296_v49 = vadd.f32 %v295_v43, %v294_v37  ;;  %v290_v51 = vrot.slane %v289_v46, 2 }
  0x57   : > { %v297_v52 = vrot.slane %v296_v49, 2  ;;  %v291_v53 = vadd.f32 %v290_v51, %v289_v46 }
  0x59   : > { %v298_v54 = vadd.f32 %v297_v52, %v296_v49  ;;  %v292_v55 = vrot.slane %v291_v53, 1 }
  0x5b   : > { %v299_v56 = vrot.slane %v298_v54, 1  ;;  %v293_v57 = vadd.f32 %v292_v55, %v291_v53 }
  0x5d   : > { %v300_v60 = vadd.f32 %v299_v56, %v298_v54 }
  0x5e   : > { %v553_v27 = vpop.eup %552 }
  0x5f   : > { %v250_v29 = vcombine.high %v553_v27, %v553_v27  ;;  %v252_v30 = vsel %vm227_vm0, %v553_v27, 0.0 }
  0x60   : > { %v253_v31 = vrot.slane %v252_v30, 4 }
  0x61   : > { %v259_v33 = vsel %vm227_vm0, %v250_v29, 0.0 }
  0x62   : > { %v254_v35 = vadd.f32 %v253_v31, %v252_v30  ;;  %v260_v36 = vrot.slane %v259_v33, 4 }
  0x64   : > { %v255_v38 = vrot.slane %v254_v35, 2  ;;  %v261_v39 = vadd.f32 %v260_v36, %v259_v33 }
  0x66   : > { %v256_v41 = vadd.f32 %v255_v38, %v254_v35  ;;  %v262_v42 = vrot.slane %v261_v39, 2 }
  0x68   : > { %v257_v44 = vrot.slane %v256_v41, 1  ;;  %v263_v45 = vadd.f32 %v262_v42, %v261_v39 }
  0x6a   : > { %v258_v47 = vadd.f32 %v257_v44, %v256_v41  ;;  %v264_v48 = vrot.slane %v263_v45, 1 }
  0x6c   : > { %v265_v50 = vadd.f32 %v264_v48, %v263_v45  ;;  %554 = vlog2.f32 %v258_v47 }
  0x6e   : > { %556 = vlog2.f32 %v265_v50 }
  0x79   : > { %v555_v58 = vpop.eup %554 }
  0x7a   : > { %v267_v59 = vmul.f32 0.6931472, %v555_v58 }
  0x7b   : > { %v557_v61 = vpop.eup %556 }
  0x7c   : > { %v269_v62 = vmul.f32 0.6931472, %v557_v61  ;;  %v301_v63 = vsub.f32 %v293_v57, %v267_v59 }
  0x7e   : > { %v302_v0 = vsub.f32 %v300_v60, %v269_v62  ;;  %v303_v1 = vmul.f32 1.442695, %v301_v63 }
  0x80   : > { %558 = vpow2.f32 %v303_v1  ;;  %v305_v2 = vmul.f32 1.442695, %v302_v0 }
  0x82   : > { %560 = vpow2.f32 %v305_v2 }
  0x8d   : > { %v559_v3 = vpop.eup %558 }
  0x8e   : > { %v307_v4 = vsub.f32 1.0, %v559_v3 }
  0x8f   : > { %v561_v5 = vpop.eup %560 }
  0x90   : > { %v308_v6 = vsub.f32 1.0, %v561_v5  ;;  %v309_v7 = vmul.f32 %v307_v4, %v307_v4 }
  0x92   : > { %v310_v8 = vmul.f32 %v308_v6, %v308_v6  ;;  %v311_v9 = vmul.f32 %v309_v7, %v301_v63 }
  0x94   : > { %v312_v10 = vmul.f32 %v310_v8, %v302_v0  ;;  %v325_v11 = vsel %vm324_vm3, %v311_v9, 0.0 }
  0x96   : > { %v326_v12 = vsel %vm324_vm3, %v312_v10, 0.0 }
  0x97   : > { %v327_v13 = vadd.f32 %v326_v12, %v325_v11 }
  0x99   : > { %328 = vadd.xlane.f32.xlu0 %v327_v13 }
 0x122   : > { %v329_v14 = vpop.xlane.xlu0 %328 }
 0x123   : > { %v330_v15 = vrot.slane %v329_v14, 4 }
 0x125   : > { %v331_v16 = vadd.f32 %v330_v15, %v329_v14 }
 0x127   : > { %v332_v17 = vrot.slane %v331_v16, 2 }
 0x129   : > { %v333_v18 = vadd.f32 %v332_v17, %v331_v16 }
 0x12b   : > { %v334_v19 = vrot.slane %v333_v18, 1 }
 0x12d   : > { %v335_v20 = vadd.f32 %v334_v19, %v333_v18 }
 0x12f   : > { %482 = vpush %v335_v20 }
 0x160   : > { %s483_s28 = spop %482 }
 0x161   : > { %v337_v21 = vstv %s483_s28 }
 0x162   : > { %338 = vst [vmem:[%s219_s21] sm:$0xff] %v337_v21 }
 0x163   : > { %631 = shalt.err (!%p628_p6)
}
 0x164   : > { %s632_s15 = scalar_lea.hbm %s352_s7, 128  ;;  %s636_s19 = scalar_lea.hbm %s904_s2, 256 }
 0x165   : > { %p633_p7 = scmp.ne.s32.totalorder %s352_s7, %s632_s15  ;;  %p637_p4 = scmp.lt.s32.totalorder %s352_s7, %s904_s2 }
 0x166   : > { %p638_p10 = scmp.lt.s32.totalorder %s636_s19, %s632_s15 }
 0x167   : > { %p634_p1 = pnand %p633_p7, %p773_p9 }
 0x168   : > { %p639_p8 = por %p638_p10, %p637_p4 }
 0x169   : > { %p635_p2 = pneg %p634_p1 }
 0x16b   : > { %p640_p0 = pnand %p639_p8, %p635_p2 }
 0x16d   : > { %643 = shalt.err (!%p640_p0)
}
 0x16e   : > { %488 = dma.vmem_to_hbm [thread:$0]  (%p773_p9), %s857_s26, 128, %s352_s7, %s340_s8  }
 0x16f PF: > { %s366_s20 = sand.u32 1, %s682_s9   ;;  %p911_p3 = scmp.ge.s32.totalorder %s702_s14, 2 }
 0x170   : > { %s367_s21 = scalar_lea.sflag [#allocation4], %s366_s20 }
 0x171   : > { %p498_p13 = pnand %p911_p3, %p780_p11 }
 0x173   : > { %p499_p5 = pneg %p498_p13 }
 0x175   : > { %677 = dma.done.wait (%p499_p5), %s367_s21, 128  }
 0x176   : > { %679 = vsyncadd (%p499_p5), %s367_s21, 4294967168  ;;  %s21_s14 = sadd.s32 1, %s702_s14   ;;  %s912_s9 = smov %s686_s10 }
 0x177   : > { %p18_p12 = scmp.ge.s32.totalorder %s21_s14, 4   ;;  %s913_s10 = smov %s690_s11 }
 0x178   : > { %s914_s11 = smov %s778_s23  ;;  %s915_s12 = smov %s698_s13 }
 0x179   : > { %s916_s13 = smov %s918_s17  ;;  %20 = sbr.rel (!%p18_p12) target bundleno = 8 (0x8), region = 86 }
 0x17e   :  { %372 = vsyncpa [#allocation3], 1 }
 0x17f   :  { %374 = vsyncpa [#allocation3 + $0x1], 1 }
 0x180   :  { %375 = vsyncpa [#allocation6], 1 }
 0x181   :  { %377 = vsyncpa [#allocation6 + $0x1], 1 }
 0x182   :  { %378 = vsyncpa [#allocation4], 1 }
 0x183   :  { %380 = vsyncpa [#allocation4 + $0x1], 1 }

</bundles_post_ra>
